<compile_context>
chip_gen: v6e
topology: v6e:2x2x1
jax: 0.10.0
libtpu: 0.0.40
codegen_flags: <defaults>
</compile_context>

<pallas_src>
import functools
import math

import jax
import jax.numpy as jnp
from jax.experimental import pallas as pl
from jax.experimental.pallas import tpu as pltpu

_LANE = 128


def _round_up(x, m):
    return (x + m - 1) // m * m


def _pad2(a, rows, cols):
    return jnp.pad(a, ((0, rows - a.shape[0]), (0, cols - a.shape[1])))


def _vmem_capacity_bytes():
    """Physical per-core VMEM (128 MiB v5e/v6e, 64 MiB v7x); conservative fallback."""
    try:
        return int(pltpu.get_tpu_info().vmem_capacity_bytes)
    except Exception:
        return 64 * 2**20


# ---------------------------------------------------------------------------
# Kernel 1:  hw2[i] = relu( sum_k adj[i,k] @ xw1[k] ) @ W2
#   grid = (row_tile i, k_tile k), k last (reduction axis), i "parallel".
#   f32 accumulator scratch of shape (blk, hid_p); relu + the tiny
#   (blk x hid x fout) epilogue GEMM are fused into the k==last finalize so the
#   N x hid hidden activation never touches HBM or persistent VMEM.
# ---------------------------------------------------------------------------
def _gcn_layer1_kernel(adj_ref, xw1_ref, w2_ref, hw2_ref, acc_ref):
    k = pl.program_id(1)

    @pl.when(k == 0)
    def _():
        acc_ref[...] = jnp.zeros_like(acc_ref)

    # N x N contraction at width hid_p (layer-1 reorder), bf16 MXU, f32 acc.
    acc_ref[...] += jnp.dot(adj_ref[...], xw1_ref[...],
                            preferred_element_type=jnp.float32)

    @pl.when(k == pl.num_programs(1) - 1)
    def _():
        h = jnp.maximum(acc_ref[...], 0.0)
        hw2_ref[...] = jnp.dot(
            h, w2_ref[...], preferred_element_type=jnp.float32
        ).astype(hw2_ref.dtype)


# ---------------------------------------------------------------------------
# Kernel 2:  out[i] = sum_k adj[i,k] @ hw2[k]
#   Accumulates directly into the revisited f32 output block -> no scratch.
# ---------------------------------------------------------------------------
def _gcn_layer2_kernel(adj_ref, hw2_ref, out_ref):
    @pl.when(pl.program_id(1) == 0)
    def _():
        out_ref[...] = jnp.zeros_like(out_ref)

    out_ref[...] += jnp.dot(adj_ref[...], hw2_ref[...],
                            preferred_element_type=jnp.float32)


def gcn_forward(adj, x, w1, w2, *, blk=None, compute_dtype=jnp.bfloat16):
    """out = adj @ relu(adj @ x @ w1) @ w2.

    adj: [N, N] dense row-normalized adjacency, x: [N, Fin],
    w1: [Fin, H] (= gc1 Linear weight transposed), w2: [H, Fout].
    compute_dtype: dtype of the streamed MXU inputs (bf16 default, f32 for parity);
    all accumulation and the final output are float32.
    """
    n = adj.shape[0]
    hid = w1.shape[1]
    fout = w2.shape[1]
    hid_p = _round_up(hid, _LANE)
    fout_p = _round_up(fout, _LANE)

    vmem_cap = _vmem_capacity_bytes()
    if blk is None:
        # 1024^2 adjacency tiles on 128-MiB-VMEM parts (v5e/v6e), 512^2 on v7x.
        blk = 1024 if vmem_cap >= 96 * 2**20 else 512
    blk = min(blk, _round_up(n, _LANE))
    n_p = _round_up(n, blk)
    r = n_p // blk

    f32 = jnp.float32
    csize = jnp.dtype(compute_dtype).itemsize

    # Layer-1 reorder: xw1 = x @ W1 is a tiny (N x Fin x H) GEMM -> do it once
    # here (plain XLA matmul) so the big NxN pass streams blk x hid_p blocks.
    xw1 = jnp.dot(x.astype(f32), w1.astype(f32), preferred_element_type=f32)

    adj_q = _pad2(adj.astype(f32), n_p, n_p).astype(compute_dtype)
    xw1_q = _pad2(xw1, n_p, hid_p).astype(compute_dtype)
    w2_p = _pad2(w2.astype(f32), hid_p, fout_p)

    # --- VMEM budgets from the actual (double-buffered) allocations ----------
    est1 = (2 * blk * blk * csize        # adj tiles, double buffered
            + 2 * blk * hid_p * csize    # xw1 tiles
            + 2 * hid_p * fout_p * 4     # w2 (constant index, still 2 bufs)
            + 2 * blk * fout_p * csize   # hw2 output tiles
            + blk * hid_p * 4)           # f32 accumulator scratch
    est2 = (2 * blk * blk * csize
            + 2 * blk * fout_p * csize
            + 2 * blk * fout_p * 4)
    cap = int(0.9 * vmem_cap)
    vmem1 = int(min(max(2 * est1, 32 * 2**20), cap))
    vmem2 = int(min(max(2 * est2, 32 * 2**20), cap))

    cost1 = pl.CostEstimate(
        flops=2 * n_p * n_p * hid_p + 2 * n_p * hid_p * fout_p,
        transcendentals=0,
        bytes_accessed=(n_p * n_p * csize + r * n_p * hid_p * csize
                        + hid_p * fout_p * 4 + n_p * fout_p * csize))
    cost2 = pl.CostEstimate(
        flops=2 * n_p * n_p * fout_p,
        transcendentals=0,
        bytes_accessed=(n_p * n_p * csize + r * n_p * fout_p * csize
                        + n_p * fout_p * 4))

    # ------------------- layer 1: hw2 = relu(adj @ xw1) @ W2 -----------------
    hw2 = pl.pallas_call(
        _gcn_layer1_kernel,
        out_shape=jax.ShapeDtypeStruct((n_p, fout_p), compute_dtype),
        grid_spec=pltpu.PrefetchScalarGridSpec(
            num_scalar_prefetch=0,
            grid=(r, r),                                         # (row, k)
            in_specs=[
                pl.BlockSpec((blk, blk), lambda i, k: (i, k)),        # adj
                pl.BlockSpec((blk, hid_p), lambda i, k: (k, 0)),      # xw1
                pl.BlockSpec((hid_p, fout_p), lambda i, k: (0, 0)),   # w2
            ],
            out_specs=pl.BlockSpec((blk, fout_p), lambda i, k: (i, 0)),
            scratch_shapes=[pltpu.VMEM((blk, hid_p), f32)],
        ),
        compiler_params=pltpu.CompilerParams(
            dimension_semantics=("parallel", "arbitrary"),
            vmem_limit_bytes=vmem1),
        cost_estimate=cost1,
    )(adj_q, xw1_q, w2_p)

    # ------------------------ layer 2: out = adj @ hw2 -----------------------
    out_p = pl.pallas_call(
        _gcn_layer2_kernel,
        out_shape=jax.ShapeDtypeStruct((n_p, fout_p), f32),
        grid_spec=pltpu.PrefetchScalarGridSpec(
            num_scalar_prefetch=0,
            grid=(r, r),
            in_specs=[
                pl.BlockSpec((blk, blk), lambda i, k: (i, k)),        # adj
                pl.BlockSpec((blk, fout_p), lambda i, k: (k, 0)),     # hw2
            ],
            out_specs=pl.BlockSpec((blk, fout_p), lambda i, k: (i, 0)),
        ),
        compiler_params=pltpu.CompilerParams(
            dimension_semantics=("parallel", "arbitrary"),
            vmem_limit_bytes=vmem2),
        cost_estimate=cost2,
    )(adj_q, hw2)

    return out_p[:n, :fout]


def xavier_uniform(key, fan_in, fan_out):
    """torch.nn.init.xavier_uniform_ on a Linear weight (fan_out, fan_in),
    returned TRANSPOSED as (fan_in, fan_out) so that x @ w == Linear(x)."""
    bound = math.sqrt(6.0 / (fan_in + fan_out))
    return jax.random.uniform(
        key, (fan_in, fan_out), dtype=jnp.float32, minval=-bound, maxval=bound)


if __name__ == "__main__":
    # Small synthetic graph: N nodes, in_dim -> hidden_dim -> out_dim.
    N, in_dim, hidden_dim, out_dim = 16, 8, 32, 4

    key = jax.random.PRNGKey(0)
    k_adj, k_x, k_w1, k_w2 = jax.random.split(key, 4)

    # Symmetric, self-looped, row-normalized dense adjacency (standard GCN prep).
    a = (jax.random.uniform(k_adj, (N, N)) > 0.7).astype(jnp.float32)
    a = jnp.maximum(a, a.T) + jnp.eye(N, dtype=jnp.float32)
    adj = a / jnp.sum(a, axis=1, keepdims=True)

    x = jax.random.normal(k_x, (N, in_dim), dtype=jnp.float32)
    w1 = xavier_uniform(k_w1, in_dim, hidden_dim)   # gc1.w.weight.T
    w2 = xavier_uniform(k_w2, hidden_dim, out_dim)  # gc2.w.weight.T

    # Reference: PyTorch eval-mode forward in plain JAX.
    ref = jnp.maximum(adj @ x @ w1, 0.0)
    ref = adj @ ref @ w2

    # f32 parity path (exact-semantics check).
    out_f32 = jax.jit(functools.partial(gcn_forward, compute_dtype=jnp.float32))(
        adj, x, w1, w2)
    jax.block_until_ready(out_f32)
    assert out_f32.shape == (N, out_dim)
    assert jnp.allclose(out_f32, ref, atol=5e-4, rtol=5e-4), (
        float(jnp.max(jnp.abs(out_f32 - ref))))

    # Default fast path: bf16 MXU inputs, f32 accumulation (looser tolerance,
    # as flagged in the performance review's correctness concerns).
    out = jax.jit(gcn_forward)(adj, x, w1, w2)
    jax.block_until_ready(out)
    assert out.shape == (N, out_dim)
    assert jnp.allclose(out, ref, atol=2e-2, rtol=2e-2), (
        float(jnp.max(jnp.abs(out - ref))))

    print("KERNEL_OK")
</pallas_src>

<mosaic_0001>
module attributes {stable_mosaic.version = 11 : i64} {
  func.func @_gcn_layer2_kernel(%arg0: i32, %arg1: i32, %arg2: memref<128x128xf32, #tpu.memory_space<vmem>>, %arg3: memref<128x128xf32, #tpu.memory_space<vmem>>, %arg4: memref<128x128xf32, #tpu.memory_space<vmem>>) attributes {dimension_semantics = [#tpu.dimension_semantics<parallel>, #tpu.dimension_semantics<arbitrary>], iteration_bounds = array<i64: 1, 1>, scalar_prefetch = 0 : i64, scratch_operands = 0 : i64, tpu.core_type = #tpu.core_type<tc>, window_params = [{transform_indices = @transform_0, window_bounds = array<i64: 128, 128>}, {transform_indices = @transform_1, window_bounds = array<i64: 128, 128>}, {transform_indices = @transform_2, window_bounds = array<i64: 128, 128>}]} {
    %c0_i32 = arith.constant 0 : i32
    %0 = arith.cmpi eq, %arg1, %c0_i32 : i32
    %1 = arith.extui %0 : i1 to i32
    %c0_i32_0 = arith.constant 0 : i32
    %2 = arith.cmpi ne, %1, %c0_i32_0 : i32
    scf.if %2 {
      %cst_8 = arith.constant 0.000000e+00 : f32
      %9 = vector.broadcast %cst_8 : f32 to vector<128x128xf32>
      %c0_9 = arith.constant 0 : index
      %c0_10 = arith.constant 0 : index
      %10 = vector.load %arg4[%c0_9, %c0_10] : memref<128x128xf32, #tpu.memory_space<vmem>>, vector<128x128xf32>
      tpu.vector_store %arg4[%c0_9, %c0_10], %9 {strides = array<i32>} : memref<128x128xf32, #tpu.memory_space<vmem>>, vector<128x128xf32>,
    } else {
    }
    %c0 = arith.constant 0 : index
    %c0_1 = arith.constant 0 : index
    %3 = vector.load %arg4[%c0, %c0_1] : memref<128x128xf32, #tpu.memory_space<vmem>>, vector<128x128xf32>
    %c0_2 = arith.constant 0 : index
    %c0_3 = arith.constant 0 : index
    %4 = vector.load %arg2[%c0_2, %c0_3] : memref<128x128xf32, #tpu.memory_space<vmem>>, vector<128x128xf32>
    %c0_4 = arith.constant 0 : index
    %c0_5 = arith.constant 0 : index
    %5 = vector.load %arg3[%c0_4, %c0_5] : memref<128x128xf32, #tpu.memory_space<vmem>>, vector<128x128xf32>
    %cst = arith.constant dense<0.000000e+00> : vector<128x128xf32>
    %6 = tpu.matmul %4, %5, %cst {dimension_numbers = #tpu.dot_dimension_numbers<[1], [0], [0], [1], [0, 0, 1, 1], [], []>} : vector<128x128xf32>, vector<128x128xf32>, vector<128x128xf32> -> vector<128x128xf32>
    %7 = arith.addf %3, %6 : vector<128x128xf32>
    %c0_6 = arith.constant 0 : index
    %c0_7 = arith.constant 0 : index
    %8 = vector.load %arg4[%c0_6, %c0_7] : memref<128x128xf32, #tpu.memory_space<vmem>>, vector<128x128xf32>
    tpu.vector_store %arg4[%c0_6, %c0_7], %7 {strides = array<i32>} : memref<128x128xf32, #tpu.memory_space<vmem>>, vector<128x128xf32>,
    return
  }
  func.func @transform_0(%arg0: i32, %arg1: i32) -> (i32, i32) {
    %c0_i32 = arith.constant 0 : i32
    return %arg0, %arg1 : i32, i32
  }
  func.func @transform_1(%arg0: i32, %arg1: i32) -> (i32, i32) {
    %c0_i32 = arith.constant 0 : i32
    %c0_i32_0 = arith.constant 0 : i32
    return %arg1, %c0_i32 : i32, i32
  }
  func.func @transform_2(%arg0: i32, %arg1: i32) -> (i32, i32) {
    %c0_i32 = arith.constant 0 : i32
    %c0_i32_0 = arith.constant 0 : i32
    return %arg0, %c0_i32 : i32, i32
  }
}

module attributes {stable_mosaic.version = 11 : i64} {
  func.func @_gcn_layer1_kernel(%arg0: i32, %arg1: i32, %arg2: memref<128x128xf32, #tpu.memory_space<vmem>>, %arg3: memref<128x128xf32, #tpu.memory_space<vmem>>, %arg4: memref<128x128xf32, #tpu.memory_space<vmem>>, %arg5: memref<128x128xf32, #tpu.memory_space<vmem>>, %arg6: memref<128x128xf32, #tpu.memory_space<vmem>>) attributes {dimension_semantics = [#tpu.dimension_semantics<parallel>, #tpu.dimension_semantics<arbitrary>], iteration_bounds = array<i64: 1, 1>, scalar_prefetch = 0 : i64, scratch_operands = 1 : i64, tpu.core_type = #tpu.core_type<tc>, window_params = [{transform_indices = @transform_0, window_bounds = array<i64: 128, 128>}, {transform_indices = @transform_1, window_bounds = array<i64: 128, 128>}, {pipeline_mode = #tpu.pipeline_mode<synchronous>, transform_indices = @transform_2, window_bounds = array<i64: 128, 128>}, {transform_indices = @transform_3, window_bounds = array<i64: 128, 128>}]} {
    %c0_i32 = arith.constant 0 : i32
    %0 = arith.cmpi eq, %arg1, %c0_i32 : i32
    %1 = arith.extui %0 : i1 to i32
    %c0_i32_0 = arith.constant 0 : i32
    %2 = arith.cmpi ne, %1, %c0_i32_0 : i32
    scf.if %2 {
      %cst_10 = arith.constant 0.000000e+00 : f32
      %12 = vector.broadcast %cst_10 : f32 to vector<128x128xf32>
      %c0_11 = arith.constant 0 : index
      %c0_12 = arith.constant 0 : index
      %13 = vector.load %arg6[%c0_11, %c0_12] : memref<128x128xf32, #tpu.memory_space<vmem>>, vector<128x128xf32>
      tpu.vector_store %arg6[%c0_11, %c0_12], %12 {strides = array<i32>} : memref<128x128xf32, #tpu.memory_space<vmem>>, vector<128x128xf32>,
    } else {
    }
    %c0 = arith.constant 0 : index
    %c0_1 = arith.constant 0 : index
    %3 = vector.load %arg6[%c0, %c0_1] : memref<128x128xf32, #tpu.memory_space<vmem>>, vector<128x128xf32>
    %c0_2 = arith.constant 0 : index
    %c0_3 = arith.constant 0 : index
    %4 = vector.load %arg2[%c0_2, %c0_3] : memref<128x128xf32, #tpu.memory_space<vmem>>, vector<128x128xf32>
    %c0_4 = arith.constant 0 : index
    %c0_5 = arith.constant 0 : index
    %5 = vector.load %arg3[%c0_4, %c0_5] : memref<128x128xf32, #tpu.memory_space<vmem>>, vector<128x128xf32>
    %cst = arith.constant dense<0.000000e+00> : vector<128x128xf32>
    %6 = tpu.matmul %4, %5, %cst {dimension_numbers = #tpu.dot_dimension_numbers<[1], [0], [0], [1], [0, 0, 1, 1], [], []>} : vector<128x128xf32>, vector<128x128xf32>, vector<128x128xf32> -> vector<128x128xf32>
    %7 = arith.addf %3, %6 : vector<128x128xf32>
    %c0_6 = arith.constant 0 : index
    %c0_7 = arith.constant 0 : index
    %8 = vector.load %arg6[%c0_6, %c0_7] : memref<128x128xf32, #tpu.memory_space<vmem>>, vector<128x128xf32>
    tpu.vector_store %arg6[%c0_6, %c0_7], %7 {strides = array<i32>} : memref<128x128xf32, #tpu.memory_space<vmem>>, vector<128x128xf32>,
    %c0_i32_8 = arith.constant 0 : i32
    %9 = arith.cmpi eq, %arg1, %c0_i32_8 : i32
    %10 = arith.extui %9 : i1 to i32
    %c0_i32_9 = arith.constant 0 : i32
    %11 = arith.cmpi ne, %10, %c0_i32_9 : i32
    scf.if %11 {
      %c0_10 = arith.constant 0 : index
      %c0_11 = arith.constant 0 : index
      %12 = vector.load %arg6[%c0_10, %c0_11] : memref<128x128xf32, #tpu.memory_space<vmem>>, vector<128x128xf32>
      %cst_12 = arith.constant 0.000000e+00 : f32
      %13 = vector.broadcast %cst_12 : f32 to vector<128x128xf32>
      %14 = arith.maximumf %12, %13 : vector<128x128xf32>
      %c0_13 = arith.constant 0 : index
      %c0_14 = arith.constant 0 : index
      %15 = vector.load %arg4[%c0_13, %c0_14] : memref<128x128xf32, #tpu.memory_space<vmem>>, vector<128x128xf32>
      %cst_15 = arith.constant dense<0.000000e+00> : vector<128x128xf32>
      %16 = tpu.matmul %14, %15, %cst_15 {dimension_numbers = #tpu.dot_dimension_numbers<[1], [0], [0], [1], [0, 0, 1, 1], [], []>} : vector<128x128xf32>, vector<128x128xf32>, vector<128x128xf32> -> vector<128x128xf32>
      %c0_16 = arith.constant 0 : index
      %c0_17 = arith.constant 0 : index
      %17 = vector.load %arg5[%c0_16, %c0_17] : memref<128x128xf32, #tpu.memory_space<vmem>>, vector<128x128xf32>
      tpu.vector_store %arg5[%c0_16, %c0_17], %16 {strides = array<i32>} : memref<128x128xf32, #tpu.memory_space<vmem>>, vector<128x128xf32>,
    } else {
    }
    return
  }
  func.func @transform_0(%arg0: i32, %arg1: i32) -> (i32, i32) {
    %c0_i32 = arith.constant 0 : i32
    return %arg0, %arg1 : i32, i32
  }
  func.func @transform_1(%arg0: i32, %arg1: i32) -> (i32, i32) {
    %c0_i32 = arith.constant 0 : i32
    %c0_i32_0 = arith.constant 0 : i32
    return %arg1, %c0_i32 : i32, i32
  }
  func.func @transform_2(%arg0: i32, %arg1: i32) -> (i32, i32) {
    %c0_i32 = arith.constant 0 : i32
    %c0_i32_0 = arith.constant 0 : i32
    %c0_i32_1 = arith.constant 0 : i32
    return %c0_i32, %c0_i32_0 : i32, i32
  }
  func.func @transform_3(%arg0: i32, %arg1: i32) -> (i32, i32) {
    %c0_i32 = arith.constant 0 : i32
    %c0_i32_0 = arith.constant 0 : i32
    return %arg0, %c0_i32 : i32, i32
  }
}

</mosaic_0001>

<bundles_post_ra>
// kernel: gcn_forward.3
= control target key start
LH: loop header
LB: loop body
LE: loop exit
PB: predicated region body
PF: predicated region fallthrough
CT: control target
= control target key end

     0   :  { %s540_s1 = inlined_call_operand.vmem [shape: f32[128,128], index: 1, kind: input, shape index: {}]   ;;  %s541_s0 = inlined_call_operand.vmem [shape: f32[128,128], index: 0, kind: input, shape index: {}]   ;;  %s542_s2 = inlined_call_operand.vmem [shape: f32[128,128], index: 2, kind: output, shape index: {}]  }
   0x1   :  { %v78_v0 = vld [vmem:[%s540_s1 + $0x78] sm:$0xff]  ;;  %v77_v1 = vld [vmem:[%s540_s1 + $0x70] sm:$0xff]  ;;  %v76_v2 = vld [vmem:[%s540_s1 + $0x68] sm:$0xff] }
   0x2   :  { %292 = vmatprep.subr.mxu0 %v78_v0  ;;  %348 = vmatprep.subr.mxu1 %v78_v0  ;;  %v75_v3 = vld [vmem:[%s540_s1 + $0x60] sm:$0xff]  ;;  %v74_v4 = vld [vmem:[%s540_s1 + $0x58] sm:$0xff]  ;;  %v73_v5 = vld [vmem:[%s540_s1 + $0x50] sm:$0xff] }
   0x3   :  { %293 = vmatpush3.msra.mxu0 %v78_v0  ;;  %364 = vmatpush3.msra.mxu1 %v78_v0  ;;  %v72_v6 = vld [vmem:[%s540_s1 + $0x48] sm:$0xff]  ;;  %v71_v7 = vld [vmem:[%s540_s1 + $0x40] sm:$0xff]  ;;  %v70_v8 = vld [vmem:[%s540_s1 + $0x38] sm:$0xff] }
   0x4   :  { %294 = vmatprep.subr.mxu0 %v77_v1  ;;  %349 = vmatprep.subr.mxu1 %v77_v1  ;;  %v69_v9 = vld [vmem:[%s540_s1 + $0x30] sm:$0xff]  ;;  %v68_v10 = vld [vmem:[%s540_s1 + $0x28] sm:$0xff]  ;;  %v67_v11 = vld [vmem:[%s540_s1 + $0x20] sm:$0xff] }
   0x5   :  { %295 = vmatpush3.msra.mxu0 %v77_v1  ;;  %365 = vmatpush3.msra.mxu1 %v77_v1  ;;  %v66_v12 = vld [vmem:[%s540_s1 + $0x18] sm:$0xff]  ;;  %v65_v13 = vld [vmem:[%s540_s1 + $0x10] sm:$0xff]  ;;  %v64_v14 = vld [vmem:[%s540_s1 + $0x8] sm:$0xff] }
   0x6   :  { %296 = vmatprep.subr.mxu0 %v76_v2  ;;  %350 = vmatprep.subr.mxu1 %v76_v2  ;;  %v63_v15 = vld [vmem:[%s540_s1] sm:$0xff]  ;;  %v48_v18 = vld [vmem:[%s541_s0 + $0x8] sm:$0xff]  ;;  %v49_v20 = vld [vmem:[%s541_s0 + $0x10] sm:$0xff] }
   0x7   :  { %297 = vmatpush3.msra.mxu0 %v76_v2  ;;  %366 = vmatpush3.msra.mxu1 %v76_v2  ;;  %v47_v16 = vld [vmem:[%s541_s0] sm:$0xff]  ;;  %v56_v19 = vld [vmem:[%s541_s0 + $0x48] sm:$0xff]  ;;  %v57_v21 = vld [vmem:[%s541_s0 + $0x50] sm:$0xff] }
   0x8   :  { %298 = vmatprep.subr.mxu0 %v75_v3  ;;  %351 = vmatprep.subr.mxu1 %v75_v3  ;;  %v55_v17 = vld [vmem:[%s541_s0 + $0x40] sm:$0xff]  ;;  %v50_v22 = vld [vmem:[%s541_s0 + $0x18] sm:$0xff]  ;;  %v52_v26 = vld [vmem:[%s541_s0 + $0x28] sm:$0xff] }
   0x9   :  { %299 = vmatpush3.msra.mxu0 %v75_v3  ;;  %367 = vmatpush3.msra.mxu1 %v75_v3  ;;  %v58_v23 = vld [vmem:[%s541_s0 + $0x58] sm:$0xff]  ;;  %v51_v24 = vld [vmem:[%s541_s0 + $0x20] sm:$0xff]  ;;  %v60_v27 = vld [vmem:[%s541_s0 + $0x68] sm:$0xff] }
   0xa   :  { %300 = vmatprep.subr.mxu0 %v74_v4  ;;  %352 = vmatprep.subr.mxu1 %v74_v4  ;;  %v59_v25 = vld [vmem:[%s541_s0 + $0x60] sm:$0xff]  ;;  %v53_v28 = vld [vmem:[%s541_s0 + $0x30] sm:$0xff]  ;;  %v54_v30 = vld [vmem:[%s541_s0 + $0x38] sm:$0xff] }
   0xb   :  { %301 = vmatpush3.msra.mxu0 %v74_v4  ;;  %368 = vmatpush3.msra.mxu1 %v74_v4  ;;  %v61_v29 = vld [vmem:[%s541_s0 + $0x70] sm:$0xff]  ;;  %v62_v31 = vld [vmem:[%s541_s0 + $0x78] sm:$0xff] }
   0xc   :  { %302 = vmatprep.subr.mxu0 %v73_v5  ;;  %353 = vmatprep.subr.mxu1 %v73_v5 }
   0xd   :  { %303 = vmatpush3.msra.mxu0 %v73_v5  ;;  %369 = vmatpush3.msra.mxu1 %v73_v5 }
   0xe   :  { %304 = vmatprep.subr.mxu0 %v72_v6  ;;  %354 = vmatprep.subr.mxu1 %v72_v6 }
   0xf   :  { %305 = vmatpush3.msra.mxu0 %v72_v6  ;;  %370 = vmatpush3.msra.mxu1 %v72_v6 }
  0x10   :  { %306 = vmatprep.subr.mxu0 %v71_v7  ;;  %355 = vmatprep.subr.mxu1 %v71_v7 }
  0x11   :  { %307 = vmatpush3.msra.mxu0 %v71_v7  ;;  %371 = vmatpush3.msra.mxu1 %v71_v7 }
  0x12   :  { %308 = vmatprep.subr.mxu0 %v70_v8  ;;  %356 = vmatprep.subr.mxu1 %v70_v8 }
  0x13   :  { %309 = vmatpush3.msra.mxu0 %v70_v8  ;;  %372 = vmatpush3.msra.mxu1 %v70_v8 }
  0x14   :  { %310 = vmatprep.subr.mxu0 %v69_v9  ;;  %357 = vmatprep.subr.mxu1 %v69_v9 }
  0x15   :  { %311 = vmatpush3.msra.mxu0 %v69_v9  ;;  %373 = vmatpush3.msra.mxu1 %v69_v9 }
  0x16   :  { %312 = vmatprep.subr.mxu0 %v68_v10  ;;  %358 = vmatprep.subr.mxu1 %v68_v10 }
  0x17   :  { %313 = vmatpush3.msra.mxu0 %v68_v10  ;;  %374 = vmatpush3.msra.mxu1 %v68_v10 }
  0x18   :  { %314 = vmatprep.subr.mxu0 %v67_v11  ;;  %359 = vmatprep.subr.mxu1 %v67_v11 }
  0x19   :  { %315 = vmatpush3.msra.mxu0 %v67_v11  ;;  %375 = vmatpush3.msra.mxu1 %v67_v11 }
  0x1a   :  { %316 = vmatprep.subr.mxu0 %v66_v12  ;;  %360 = vmatprep.subr.mxu1 %v66_v12 }
  0x1b   :  { %317 = vmatpush3.msra.mxu0 %v66_v12  ;;  %376 = vmatpush3.msra.mxu1 %v66_v12 }
  0x1c   :  { %318 = vmatprep.subr.mxu0 %v65_v13  ;;  %361 = vmatprep.subr.mxu1 %v65_v13 }
  0x1d   :  { %319 = vmatpush3.msra.mxu0 %v65_v13  ;;  %377 = vmatpush3.msra.mxu1 %v65_v13 }
  0x1e   :  { %320 = vmatprep.subr.mxu0 %v64_v14  ;;  %362 = vmatprep.subr.mxu1 %v64_v14 }
  0x1f   :  { %321 = vmatpush3.msra.mxu0 %v64_v14  ;;  %378 = vmatpush3.msra.mxu1 %v64_v14 }
  0x20   :  { %322 = vmatprep.subr.mxu0 %v63_v15  ;;  %363 = vmatprep.subr.mxu1 %v63_v15 }
  0x21   :  { %323 = vmatpush3.msra.mxu0 %v63_v15  ;;  %379 = vmatpush3.msra.mxu1 %v63_v15 }
  0x22   :  { %324 = vmatprep.mubr.f32.mxu0 %v47_v16  ;;  %336 = vmatprep.mubr.f32.mxu1 %v55_v17 }
  0x23   :  { %325 = vmatmul.mubr.f32.vlgmr.msra.gmra.mxu0 %v48_v18  ;;  %337 = vmatmul.mubr.f32.vlgmr.msra.gmra.mxu1 %v56_v19 }
  0x24   :  { %327 = vmatprep.mubr.f32.mxu0 %v49_v20  ;;  %339 = vmatprep.mubr.f32.mxu1 %v57_v21 }
  0x27   :  { %328 = vmatmul.mubr.f32.gmra.mxu0 %v50_v22  ;;  %340 = vmatmul.mubr.f32.gmra.mxu1 %v58_v23 }
  0x28   :  { %330 = vmatprep.mubr.f32.mxu0 %v51_v24  ;;  %342 = vmatprep.mubr.f32.mxu1 %v59_v25 }
  0x2b   :  { %331 = vmatmul.mubr.f32.gmra.mxu0 %v52_v26  ;;  %343 = vmatmul.mubr.f32.gmra.mxu1 %v60_v27 }
  0x2c   :  { %333 = vmatprep.mubr.f32.mxu0 %v53_v28  ;;  %345 = vmatprep.mubr.f32.mxu1 %v61_v29 }
  0x2f   :  { %334 = vmatmul.mubr.f32.gmra.mxu0 %v54_v30  ;;  %346 = vmatmul.mubr.f32.gmra.mxu1 %v62_v31 }
  0xe3   :  { %v326_v32 = vpop.f32.mrf.mxu0  ;;  %v338_v33 = vpop.f32.mrf.mxu1 }
  0xe4   :  { %241 = vst [vmem:[%s542_s2 + $0x8] sm:$0xff] %v326_v32  ;;  %249 = vst [vmem:[%s542_s2 + $0x48] sm:$0xff] %v338_v33 }
  0xe5   :  { %v145_v34 = vpop.f32.mrf.mxu0  ;;  %v185_v35 = vpop.f32.mrf.mxu1 }
  0xe6   :  { %240 = vst [vmem:[%s542_s2] sm:$0xff] %v145_v34  ;;  %248 = vst [vmem:[%s542_s2 + $0x40] sm:$0xff] %v185_v35 }
  0xe7   :  { %v329_v36 = vpop.f32.mrf.mxu0  ;;  %v341_v37 = vpop.f32.mrf.mxu1 }
  0xe8   :  { %243 = vst [vmem:[%s542_s2 + $0x18] sm:$0xff] %v329_v36  ;;  %251 = vst [vmem:[%s542_s2 + $0x58] sm:$0xff] %v341_v37 }
  0xe9   :  { %v155_v38 = vpop.f32.mrf.mxu0  ;;  %v195_v39 = vpop.f32.mrf.mxu1 }
  0xea   :  { %242 = vst [vmem:[%s542_s2 + $0x10] sm:$0xff] %v155_v38  ;;  %250 = vst [vmem:[%s542_s2 + $0x50] sm:$0xff] %v195_v39 }
  0xeb   :  { %v332_v40 = vpop.f32.mrf.mxu0  ;;  %v344_v41 = vpop.f32.mrf.mxu1 }
  0xec   :  { %245 = vst [vmem:[%s542_s2 + $0x28] sm:$0xff] %v332_v40  ;;  %253 = vst [vmem:[%s542_s2 + $0x68] sm:$0xff] %v344_v41 }
  0xed   :  { %v165_v42 = vpop.f32.mrf.mxu0  ;;  %v205_v43 = vpop.f32.mrf.mxu1 }
  0xee   :  { %244 = vst [vmem:[%s542_s2 + $0x20] sm:$0xff] %v165_v42  ;;  %252 = vst [vmem:[%s542_s2 + $0x60] sm:$0xff] %v205_v43 }
  0xef   :  { %v335_v44 = vpop.f32.mrf.mxu0  ;;  %v347_v45 = vpop.f32.mrf.mxu1 }
  0xf0   :  { %247 = vst [vmem:[%s542_s2 + $0x38] sm:$0xff] %v335_v44  ;;  %255 = vst [vmem:[%s542_s2 + $0x78] sm:$0xff] %v347_v45 }
  0xf1   :  { %v175_v46 = vpop.f32.mrf.mxu0  ;;  %v215_v47 = vpop.f32.mrf.mxu1 }
  0xf2   :  { %246 = vst [vmem:[%s542_s2 + $0x30] sm:$0xff] %v175_v46  ;;  %254 = vst [vmem:[%s542_s2 + $0x70] sm:$0xff] %v215_v47 }

// kernel: gcn_forward.2
= control target key start
LH: loop header
LB: loop body
LE: loop exit
PB: predicated region body
PF: predicated region fallthrough
CT: control target
= control target key end

     0   :  { %s863_s1 = inlined_call_operand.vmem [shape: f32[128,128], index: 1, kind: input, shape index: {}]   ;;  %s864_s0 = inlined_call_operand.vmem [shape: f32[128,128], index: 0, kind: input, shape index: {}]   ;;  %s865_s2 = inlined_call_operand.vmem [shape: f32[128,128], index: 2, kind: input, shape index: {}]   ;;  %s866_s3 = inlined_call_operand.vmem [shape: f32[128,128], index: 3, kind: output, shape index: {}]  }
   0x1   :  { %v81_v0 = vld [vmem:[%s863_s1 + $0x78] sm:$0xff]  ;;  %v80_v1 = vld [vmem:[%s863_s1 + $0x70] sm:$0xff]  ;;  %v79_v2 = vld [vmem:[%s863_s1 + $0x68] sm:$0xff] }
   0x2   :  { %539 = vmatprep.subr.mxu0 %v81_v0  ;;  %v78_v3 = vld [vmem:[%s863_s1 + $0x60] sm:$0xff]  ;;  %v77_v5 = vld [vmem:[%s863_s1 + $0x58] sm:$0xff]  ;;  %v76_v6 = vld [vmem:[%s863_s1 + $0x50] sm:$0xff] }
   0x3   :  { %540 = vmatpush3.msra.mxu0 %v81_v0  ;;  %v50_v4 = vld [vmem:[%s864_s0] sm:$0xff]  ;;  %v75_v7 = vld [vmem:[%s863_s1 + $0x48] sm:$0xff]  ;;  %v309_v8 = vld [vmem:[%s865_s2 + $0x78] sm:$0xff] }
   0x4   :  { %541 = vmatprep.subr.mxu0 %v80_v1  ;;  %571 = vmatprep.mubr.f32.mxu0 %v50_v4  ;;  %v308_v9 = vld [vmem:[%s865_s2 + $0x70] sm:$0xff]  ;;  %v74_v10 = vld [vmem:[%s863_s1 + $0x40] sm:$0xff]  ;;  %v307_v11 = vld [vmem:[%s865_s2 + $0x68] sm:$0xff] }
   0x5   :  { %542 = vmatpush3.msra.mxu0 %v80_v1  ;;  %595 = vmatprep.subr.mxu1 %v309_v8  ;;  %v73_v12 = vld [vmem:[%s863_s1 + $0x38] sm:$0xff]  ;;  %v306_v13 = vld [vmem:[%s865_s2 + $0x60] sm:$0xff]  ;;  %v72_v14 = vld [vmem:[%s863_s1 + $0x30] sm:$0xff] }
   0x6   :  { %543 = vmatprep.subr.mxu0 %v79_v2  ;;  %596 = vmatpush3.msra.mxu1 %v309_v8  ;;  %v305_v15 = vld [vmem:[%s865_s2 + $0x58] sm:$0xff]  ;;  %v71_v16 = vld [vmem:[%s863_s1 + $0x28] sm:$0xff]  ;;  %v304_v17 = vld [vmem:[%s865_s2 + $0x50] sm:$0xff] }
   0x7   :  { %544 = vmatpush3.msra.mxu0 %v79_v2  ;;  %597 = vmatprep.subr.mxu1 %v308_v9  ;;  %v70_v18 = vld [vmem:[%s863_s1 + $0x20] sm:$0xff]  ;;  %v303_v19 = vld [vmem:[%s865_s2 + $0x48] sm:$0xff]  ;;  %v69_v20 = vld [vmem:[%s863_s1 + $0x18] sm:$0xff] }
   0x8   :  { %545 = vmatprep.subr.mxu0 %v78_v3  ;;  %598 = vmatpush3.msra.mxu1 %v308_v9  ;;  %v302_v21 = vld [vmem:[%s865_s2 + $0x40] sm:$0xff]  ;;  %v68_v22 = vld [vmem:[%s863_s1 + $0x10] sm:$0xff]  ;;  %v301_v23 = vld [vmem:[%s865_s2 + $0x38] sm:$0xff] }
   0x9   :  { %546 = vmatpush3.msra.mxu0 %v78_v3  ;;  %599 = vmatprep.subr.mxu1 %v307_v11  ;;  %v67_v24 = vld [vmem:[%s863_s1 + $0x8] sm:$0xff]  ;;  %v300_v25 = vld [vmem:[%s865_s2 + $0x30] sm:$0xff]  ;;  %v66_v26 = vld [vmem:[%s863_s1] sm:$0xff] }
   0xa   :  { %547 = vmatprep.subr.mxu0 %v77_v5  ;;  %600 = vmatpush3.msra.mxu1 %v307_v11  ;;  %v299_v27 = vld [vmem:[%s865_s2 + $0x28] sm:$0xff]  ;;  %v298_v29 = vld [vmem:[%s865_s2 + $0x20] sm:$0xff]  ;;  %v52_v30 = vld [vmem:[%s864_s0 + $0x10] sm:$0xff] }
   0xb   :  { %548 = vmatpush3.msra.mxu0 %v77_v5  ;;  %601 = vmatprep.subr.mxu1 %v306_v13  ;;  %v51_v28 = vld [vmem:[%s864_s0 + $0x8] sm:$0xff]  ;;  %v297_v31 = vld [vmem:[%s865_s2 + $0x18] sm:$0xff]  ;;  %v54_v33 = vld [vmem:[%s864_s0 + $0x20] sm:$0xff] }
   0xc   :  { %549 = vmatprep.subr.mxu0 %v76_v6  ;;  %602 = vmatpush3.msra.mxu1 %v306_v13  ;;  %v53_v32 = vld [vmem:[%s864_s0 + $0x18] sm:$0xff]  ;;  %v55_v34 = vld [vmem:[%s864_s0 + $0x28] sm:$0xff]  ;;  %v56_v35 = vld [vmem:[%s864_s0 + $0x30] sm:$0xff] }
   0xd   :  { %550 = vmatpush3.msra.mxu0 %v76_v6  ;;  %603 = vmatprep.subr.mxu1 %v305_v15  ;;  %v57_v36 = vld [vmem:[%s864_s0 + $0x38] sm:$0xff]  ;;  %v58_v37 = vld [vmem:[%s864_s0 + $0x40] sm:$0xff]  ;;  %v59_v38 = vld [vmem:[%s864_s0 + $0x48] sm:$0xff] }
   0xe   :  { %551 = vmatprep.subr.mxu0 %v75_v7  ;;  %604 = vmatpush3.msra.mxu1 %v305_v15  ;;  %v60_v39 = vld [vmem:[%s864_s0 + $0x50] sm:$0xff]  ;;  %v61_v40 = vld [vmem:[%s864_s0 + $0x58] sm:$0xff]  ;;  %v62_v41 = vld [vmem:[%s864_s0 + $0x60] sm:$0xff] }
   0xf   :  { %552 = vmatpush3.msra.mxu0 %v75_v7  ;;  %605 = vmatprep.subr.mxu1 %v304_v17  ;;  %v63_v42 = vld [vmem:[%s864_s0 + $0x68] sm:$0xff]  ;;  %v64_v43 = vld [vmem:[%s864_s0 + $0x70] sm:$0xff]  ;;  %v65_v44 = vld [vmem:[%s864_s0 + $0x78] sm:$0xff] }
  0x10   :  { %553 = vmatprep.subr.mxu0 %v74_v10  ;;  %606 = vmatpush3.msra.mxu1 %v304_v17  ;;  %v296_v45 = vld [vmem:[%s865_s2 + $0x10] sm:$0xff]  ;;  %v295_v46 = vld [vmem:[%s865_s2 + $0x8] sm:$0xff]  ;;  %v294_v47 = vld [vmem:[%s865_s2] sm:$0xff] }
  0x11   :  { %554 = vmatpush3.msra.mxu0 %v74_v10  ;;  %607 = vmatprep.subr.mxu1 %v303_v19 }
  0x12   :  { %555 = vmatprep.subr.mxu0 %v73_v12  ;;  %608 = vmatpush3.msra.mxu1 %v303_v19 }
  0x13   :  { %556 = vmatpush3.msra.mxu0 %v73_v12  ;;  %609 = vmatprep.subr.mxu1 %v302_v21 }
  0x14   :  { %557 = vmatprep.subr.mxu0 %v72_v14  ;;  %610 = vmatpush3.msra.mxu1 %v302_v21 }
  0x15   :  { %558 = vmatpush3.msra.mxu0 %v72_v14  ;;  %611 = vmatprep.subr.mxu1 %v301_v23 }
  0x16   :  { %559 = vmatprep.subr.mxu0 %v71_v16  ;;  %612 = vmatpush3.msra.mxu1 %v301_v23 }
  0x17   :  { %560 = vmatpush3.msra.mxu0 %v71_v16  ;;  %613 = vmatprep.subr.mxu1 %v300_v25 }
  0x18   :  { %561 = vmatprep.subr.mxu0 %v70_v18  ;;  %614 = vmatpush3.msra.mxu1 %v300_v25 }
  0x19   :  { %562 = vmatpush3.msra.mxu0 %v70_v18  ;;  %615 = vmatprep.subr.mxu1 %v299_v27 }
  0x1a   :  { %563 = vmatprep.subr.mxu0 %v69_v20  ;;  %616 = vmatpush3.msra.mxu1 %v299_v27 }
  0x1b   :  { %564 = vmatpush3.msra.mxu0 %v69_v20  ;;  %617 = vmatprep.subr.mxu1 %v298_v29 }
  0x1c   :  { %565 = vmatprep.subr.mxu0 %v68_v22  ;;  %618 = vmatpush3.msra.mxu1 %v298_v29 }
  0x1d   :  { %566 = vmatpush3.msra.mxu0 %v68_v22  ;;  %619 = vmatprep.subr.mxu1 %v297_v31 }
  0x1e   :  { %567 = vmatprep.subr.mxu0 %v67_v24  ;;  %620 = vmatpush3.msra.mxu1 %v297_v31 }
  0x1f   :  { %568 = vmatpush3.msra.mxu0 %v67_v24  ;;  %621 = vmatprep.subr.mxu1 %v296_v45 }
  0x20   :  { %569 = vmatprep.subr.mxu0 %v66_v26  ;;  %622 = vmatpush3.msra.mxu1 %v296_v45 }
  0x21   :  { %570 = vmatpush3.msra.mxu0 %v66_v26  ;;  %623 = vmatprep.subr.mxu1 %v295_v46 }
  0x22   :  { %572 = vmatmul.mubr.f32.vlgmr.msra.gmra.mxu0 %v51_v28  ;;  %624 = vmatpush3.msra.mxu1 %v295_v46 }
  0x23   :  { %574 = vmatprep.mubr.f32.mxu0 %v52_v30  ;;  %625 = vmatprep.subr.mxu1 %v294_v47 }
  0x24   :  { %626 = vmatpush3.msra.mxu1 %v294_v47 }
  0x26   :  { %575 = vmatmul.mubr.f32.gmra.mxu0 %v53_v32 }
  0x27   :  { %577 = vmatprep.mubr.f32.mxu0 %v54_v33 }
  0x2a   :  { %578 = vmatmul.mubr.f32.gmra.mxu0 %v55_v34 }
  0x2b   :  { %580 = vmatprep.mubr.f32.mxu0 %v56_v35 }
  0x2e   :  { %581 = vmatmul.mubr.f32.gmra.mxu0 %v57_v36 }
  0x2f   :  { %583 = vmatprep.mubr.f32.mxu0 %v58_v37 }
  0x32   :  { %584 = vmatmul.mubr.f32.gmra.mxu0 %v59_v38 }
  0x33   :  { %586 = vmatprep.mubr.f32.mxu0 %v60_v39 }
  0x36   :  { %587 = vmatmul.mubr.f32.gmra.mxu0 %v61_v40 }
  0x37   :  { %589 = vmatprep.mubr.f32.mxu0 %v62_v41 }
  0x3a   :  { %590 = vmatmul.mubr.f32.gmra.mxu0 %v63_v42 }
  0x3b   :  { %592 = vmatprep.mubr.f32.mxu0 %v64_v43 }
  0x3e   :  { %593 = vmatmul.mubr.f32.gmra.mxu0 %v65_v44 }
  0xe2   :  { %v573_v48 = vpop.f32.mrf.mxu0 }
  0xe3   :  { %v279_v51 = vmax.f32 %v573_v48, 0.0 }
  0xe4   :  { %v148_v49 = vpop.f32.mrf.mxu0 }
  0xe5   :  { %v278_v50 = vmax.f32 %v148_v49, 0.0 }
  0xe6   :  { %v576_v52 = vpop.f32.mrf.mxu0 }
  0xe7   :  { %627 = vmatprep.mubr.f32.mxu1 %v278_v50  ;;  %v281_v55 = vmax.f32 %v576_v52, 0.0 }
  0xe8   :  { %v158_v53 = vpop.f32.mrf.mxu0  ;;  %628 = vmatmul.mubr.f32.vlgmr.msra.gmra.mxu1 %v279_v51 }
  0xe9   :  { %v280_v54 = vmax.f32 %v158_v53, 0.0 }
  0xea   :  { %v579_v56 = vpop.f32.mrf.mxu0 }
  0xeb   :  { %630 = vmatprep.mubr.f32.mxu1 %v280_v54  ;;  %v283_v59 = vmax.f32 %v579_v56, 0.0 }
  0xec   :  { %v168_v57 = vpop.f32.mrf.mxu0  ;;  %631 = vmatmul.mubr.f32.gmra.mxu1 %v281_v55 }
  0xed   :  { %v282_v58 = vmax.f32 %v168_v57, 0.0 }
  0xee   :  { %v582_v60 = vpop.f32.mrf.mxu0 }
  0xef   :  { %633 = vmatprep.mubr.f32.mxu1 %v282_v58  ;;  %v285_v63 = vmax.f32 %v582_v60, 0.0 }
  0xf0   :  { %v178_v61 = vpop.f32.mrf.mxu0  ;;  %634 = vmatmul.mubr.f32.gmra.mxu1 %v283_v59 }
  0xf1   :  { %v284_v62 = vmax.f32 %v178_v61, 0.0 }
  0xf2   :  { %v585_v0 = vpop.f32.mrf.mxu0 }
  0xf3   :  { %636 = vmatprep.mubr.f32.mxu1 %v284_v62  ;;  %v287_v3 = vmax.f32 %v585_v0, 0.0 }
  0xf4   :  { %v188_v1 = vpop.f32.mrf.mxu0  ;;  %637 = vmatmul.mubr.f32.gmra.mxu1 %v285_v63 }
  0xf5   :  { %v286_v2 = vmax.f32 %v188_v1, 0.0 }
  0xf6   :  { %v588_v4 = vpop.f32.mrf.mxu0 }
  0xf7   :  { %639 = vmatprep.mubr.f32.mxu1 %v286_v2  ;;  %v289_v7 = vmax.f32 %v588_v4, 0.0 }
  0xf8   :  { %v198_v5 = vpop.f32.mrf.mxu0  ;;  %640 = vmatmul.mubr.f32.gmra.mxu1 %v287_v3 }
  0xf9   :  { %v288_v6 = vmax.f32 %v198_v5, 0.0 }
  0xfa   :  { %v591_v8 = vpop.f32.mrf.mxu0 }
  0xfb   :  { %642 = vmatprep.mubr.f32.mxu1 %v288_v6  ;;  %v291_v11 = vmax.f32 %v591_v8, 0.0 }
  0xfc   :  { %v208_v9 = vpop.f32.mrf.mxu0  ;;  %643 = vmatmul.mubr.f32.gmra.mxu1 %v289_v7 }
  0xfd   :  { %v290_v10 = vmax.f32 %v208_v9, 0.0 }
  0xfe   :  { %v594_v12 = vpop.f32.mrf.mxu0 }
  0xff   :  { %645 = vmatprep.mubr.f32.mxu1 %v290_v10  ;;  %v293_v15 = vmax.f32 %v594_v12, 0.0 }
 0x100   :  { %v218_v13 = vpop.f32.mrf.mxu0  ;;  %646 = vmatmul.mubr.f32.gmra.mxu1 %v291_v11 }
 0x101   :  { %v292_v14 = vmax.f32 %v218_v13, 0.0 }
 0x103   :  { %648 = vmatprep.mubr.f32.mxu1 %v292_v14 }
 0x104   :  { %649 = vmatmul.mubr.f32.gmra.mxu1 %v293_v15 }
 0x1a8   :  { %v629_v16 = vpop.f32.mrf.mxu1 }
 0x1a9   :  { %456 = vst [vmem:[%s866_s3 + $0x8] sm:$0xff] %v629_v16 }
 0x1aa   :  { %v376_v17 = vpop.f32.mrf.mxu1 }
 0x1ab   :  { %455 = vst [vmem:[%s866_s3] sm:$0xff] %v376_v17 }
 0x1ac   :  { %v632_v18 = vpop.f32.mrf.mxu1 }
 0x1ad   :  { %458 = vst [vmem:[%s866_s3 + $0x18] sm:$0xff] %v632_v18 }
 0x1ae   :  { %v386_v19 = vpop.f32.mrf.mxu1 }
 0x1af   :  { %457 = vst [vmem:[%s866_s3 + $0x10] sm:$0xff] %v386_v19 }
 0x1b0   :  { %v635_v20 = vpop.f32.mrf.mxu1 }
 0x1b1   :  { %460 = vst [vmem:[%s866_s3 + $0x28] sm:$0xff] %v635_v20 }
 0x1b2   :  { %v396_v21 = vpop.f32.mrf.mxu1 }
 0x1b3   :  { %459 = vst [vmem:[%s866_s3 + $0x20] sm:$0xff] %v396_v21 }
 0x1b4   :  { %v638_v22 = vpop.f32.mrf.mxu1 }
 0x1b5   :  { %462 = vst [vmem:[%s866_s3 + $0x38] sm:$0xff] %v638_v22 }
 0x1b6   :  { %v406_v23 = vpop.f32.mrf.mxu1 }
 0x1b7   :  { %461 = vst [vmem:[%s866_s3 + $0x30] sm:$0xff] %v406_v23 }
 0x1b8   :  { %v641_v24 = vpop.f32.mrf.mxu1 }
 0x1b9   :  { %464 = vst [vmem:[%s866_s3 + $0x48] sm:$0xff] %v641_v24 }
 0x1ba   :  { %v416_v25 = vpop.f32.mrf.mxu1 }
 0x1bb   :  { %463 = vst [vmem:[%s866_s3 + $0x40] sm:$0xff] %v416_v25 }
 0x1bc   :  { %v644_v26 = vpop.f32.mrf.mxu1 }
 0x1bd   :  { %466 = vst [vmem:[%s866_s3 + $0x58] sm:$0xff] %v644_v26 }
 0x1be   :  { %v426_v27 = vpop.f32.mrf.mxu1 }
 0x1bf   :  { %465 = vst [vmem:[%s866_s3 + $0x50] sm:$0xff] %v426_v27 }
 0x1c0   :  { %v647_v28 = vpop.f32.mrf.mxu1 }
 0x1c1   :  { %468 = vst [vmem:[%s866_s3 + $0x68] sm:$0xff] %v647_v28 }
 0x1c2   :  { %v436_v29 = vpop.f32.mrf.mxu1 }
 0x1c3   :  { %467 = vst [vmem:[%s866_s3 + $0x60] sm:$0xff] %v436_v29 }
 0x1c4   :  { %v650_v30 = vpop.f32.mrf.mxu1 }
 0x1c5   :  { %470 = vst [vmem:[%s866_s3 + $0x78] sm:$0xff] %v650_v30 }
 0x1c6   :  { %v446_v31 = vpop.f32.mrf.mxu1 }
 0x1c7   :  { %469 = vst [vmem:[%s866_s3 + $0x70] sm:$0xff] %v446_v31 }

</bundles_post_ra>
